<compile_context>
chip_gen: v7x
topology: tpu7x:2x2x1
jax: 0.10.0
libtpu: 0.0.40
codegen_flags: <defaults>
</compile_context>

<pallas_src>
import functools

import jax
import jax.numpy as jnp
from jax import lax
from jax.experimental import pallas as pl
from jax.experimental.pallas import tpu as pltpu


# ---------------------------------------------------------------------------
# Hardware-aware sizing helpers
# ---------------------------------------------------------------------------
@functools.lru_cache(maxsize=None)
def _vmem_capacity_bytes():
    try:
        info_fn = getattr(pltpu, "get_tpu_info", None)
        if info_fn is not None:
            cap = getattr(info_fn(), "vmem_capacity_bytes", None)
            if cap:
                return int(cap)
    except Exception:
        pass
    return 64 * 1024 * 1024          # conservative fallback: v7x per-TC VMEM


@functools.lru_cache(maxsize=None)
def _vmem_limit_bytes():
    # Leave headroom for Mosaic internal scratch; cap well below physical VMEM.
    return min(_vmem_capacity_bytes() - (16 << 20), 96 << 20)


def _sublane_align(dtype):
    """Dtype-aware sublane alignment: 8 (f32) / 16 (bf16) / 32 (int8, fp8)."""
    return max(8, 32 // jnp.dtype(dtype).itemsize)


def _cdiv(a, b):
    return -(-a // b)


def _pick_block(dim, target, align):
    """Full dim if it already fits, else largest multiple of `align` <= target.

    Ragged tails are handled by cdiv grids (+ in-kernel masking where needed)."""
    if dim <= target:
        return dim
    return max(align, (target // align) * align)


def _shrink_for_cores(dim, blk, align, other_parallel, min_items=4):
    """Shrink blk so other_parallel * ceil(dim/blk) >= min_items.

    v7x has 2 TensorCores; dimension_semantics shards the parallel grid axes
    across them, so we want at least 2x as many parallel items as cores."""
    while other_parallel * _cdiv(dim, blk) < min_items and blk > align:
        nxt = max(align, ((blk // 2) // align) * align)
        if nxt >= blk:
            break
        blk = nxt
    return blk


# ---------------------------------------------------------------------------
# Stage 1: online-softmax entropy importance (+ fused tie-break noise).
# ---------------------------------------------------------------------------
def _make_entropy_kernel(v_total, tv):
    ragged_v = (v_total % tv) != 0

    def kernel(logits_ref, noise_ref, imp_ref, m_ref, l_ref, t_ref):
        v = pl.program_id(2)

        @pl.when(v == 0)
        def _():
            # Finite sentinel (not -inf) so first-step correction terms
            # (alpha * l, delta * l with l == 0) stay 0 instead of NaN.
            m_ref[...] = jnp.full_like(m_ref, -1e30)
            l_ref[...] = jnp.zeros_like(l_ref)
            t_ref[...] = jnp.zeros_like(t_ref)

        x = logits_ref[0].astype(jnp.float32)                     # (TS, TV)
        if ragged_v:
            # Mask the out-of-range lanes of the last (ragged) vocab tile with
            # a large-negative *finite* fill.
            lane = lax.broadcasted_iota(jnp.int32, x.shape, 1)
            x = jnp.where(v * tv + lane < v_total, x, -1e30)

        m_old = m_ref[...]                                        # (TS, 1)
        l_old = l_ref[...]
        t_old = t_ref[...]

        m_new = jnp.maximum(m_old, jnp.max(x, axis=-1, keepdims=True))
        delta = m_old - m_new                                     # <= 0, finite
        alpha = jnp.exp(delta)
        shifted = x - m_new
        e = jnp.exp(shifted)
        # Guard 0 * (-inf) = NaN when logits contain -inf (masked vocab).
        es = jnp.where(shifted > -80.0, e * shifted, 0.0)
        # L = sum exp(x - m),  T = sum exp(x - m) * (x - m) under running max.
        l_new = alpha * l_old + jnp.sum(e, axis=-1, keepdims=True)
        t_new = alpha * (t_old + delta * l_old) + jnp.sum(es, axis=-1, keepdims=True)

        m_ref[...] = m_new
        l_ref[...] = l_new
        t_ref[...] = t_new

        @pl.when(v == pl.num_programs(2) - 1)
        def _():
            # importance = -entropy = T/L - log(L); add tie-break noise here so
            # no separate XLA elementwise pass is needed between the kernels.
            inv_l = pl.reciprocal(l_new)
            imp_ref[0] = (t_new * inv_l - jnp.log(l_new)) + noise_ref[0]

    return kernel


def _entropy_noisy_importance(logits, noise):
    """Returns -entropy(softmax(logits, -1)) + noise, shape (B, S, 1), f32."""
    B, S, V = logits.shape
    itemsize = jnp.dtype(logits.dtype).itemsize
    align = _sublane_align(logits.dtype)

    ts = _pick_block(S, 256, align)
    ts = _shrink_for_cores(S, ts, align, B)
    tile_bytes = min(8 << 20, _vmem_limit_bytes() // 4)   # double-buffered logits
    tv = _pick_block(V, max(128, tile_bytes // max(1, ts * itemsize)), 128)
    grid = (B, _cdiv(S, ts), _cdiv(V, tv))

    noise3 = noise.reshape(B, S, 1).astype(jnp.float32)

    cost = pl.CostEstimate(
        flops=int(6 * B * S * V),
        transcendentals=int(2 * B * S * V),
        bytes_accessed=int(B * S * V * itemsize + 2 * B * S * 4),
    )
    return pl.pallas_call(
        _make_entropy_kernel(V, tv),
        out_shape=jax.ShapeDtypeStruct((B, S, 1), jnp.float32),
        grid_spec=pltpu.PrefetchScalarGridSpec(
            num_scalar_prefetch=0,
            grid=grid,
            in_specs=[
                pl.BlockSpec((1, ts, tv), lambda b, s, v: (b, s, v)),
                pl.BlockSpec((1, ts, 1), lambda b, s, v: (b, s, 0)),
            ],
            out_specs=pl.BlockSpec((1, ts, 1), lambda b, s, v: (b, s, 0)),
            scratch_shapes=[pltpu.VMEM((ts, 1), jnp.float32)] * 3,
        ),
        compiler_params=pltpu.CompilerParams(
            dimension_semantics=("parallel", "parallel", "arbitrary"),
            vmem_limit_bytes=_vmem_limit_bytes(),
        ),
        cost_estimate=cost,
    )(logits, noise3)


# ---------------------------------------------------------------------------
# Stage 2: out = where(noisy >= per-batch threshold, emb, 0).
# ---------------------------------------------------------------------------
def _mask_multiply_kernel(thr_ref, noisy_ref, emb_ref, out_ref):
    b = pl.program_id(0)
    keep = noisy_ref[0] >= thr_ref[b]                           # (TS, 1) bool
    out_ref[0] = jnp.where(keep, emb_ref[0], 0).astype(out_ref.dtype)


def _mask_multiply(embeddings, noisy3, thresholds):
    B, S, D = embeddings.shape
    itemsize = jnp.dtype(embeddings.dtype).itemsize
    align = _sublane_align(embeddings.dtype)

    # emb in + emb out, each double-buffered -> ~4x tile bytes of VMEM.
    tile_bytes = min(8 << 20, _vmem_limit_bytes() // 6)
    ts = _pick_block(S, max(align, tile_bytes // max(1, D * itemsize)), align)
    ts = _shrink_for_cores(S, ts, align, B)
    grid = (B, _cdiv(S, ts))

    cost = pl.CostEstimate(
        flops=int(B * S * D),
        transcendentals=0,
        bytes_accessed=int(2 * B * S * D * itemsize + B * S * 4 + B * 4),
    )
    return pl.pallas_call(
        _mask_multiply_kernel,
        out_shape=jax.ShapeDtypeStruct((B, S, D), embeddings.dtype),
        grid_spec=pltpu.PrefetchScalarGridSpec(
            num_scalar_prefetch=1,                              # thresholds -> SMEM
            grid=grid,
            in_specs=[
                pl.BlockSpec((1, ts, 1), lambda b, s, thr: (b, s, 0)),
                pl.BlockSpec((1, ts, D), lambda b, s, thr: (b, s, 0)),
            ],
            out_specs=pl.BlockSpec((1, ts, D), lambda b, s, thr: (b, s, 0)),
        ),
        compiler_params=pltpu.CompilerParams(
            dimension_semantics=("parallel", "parallel"),
            vmem_limit_bytes=_vmem_limit_bytes(),
        ),
        cost_estimate=cost,
    )(thresholds.astype(jnp.float32), noisy3, embeddings)


# ---------------------------------------------------------------------------
# Wrapper (TokenImportanceDropout.forward, method='entropy')
# ---------------------------------------------------------------------------
def token_importance_dropout(
    embeddings,
    logits,
    noise,
    *,
    drop_prob,
    training=True,
    schedule="constant",
    current_step=None,
    total_steps=None,
):
    """JAX/Pallas equivalent of TokenImportanceDropout.forward (method='entropy').

    `noise` is the tie-break noise (torch.randn_like(scores) * 1e-5), shape (B, S),
    pre-scaled by the caller.
    """
    if not training or drop_prob == 0:
        return embeddings

    # get_current_drop_prob (static schedule logic stays as Python glue).
    if schedule == "linear_decay" and current_step is not None and total_steps is not None:
        p = drop_prob * max(0, 1 - current_step / total_steps)
    else:
        p = drop_prob

    B, S, _ = embeddings.shape
    if p == 0:
        return embeddings
    num_to_keep = int(S * (1 - p))
    if num_to_keep >= S:
        return embeddings
    if num_to_keep == 0:
        return jnp.zeros_like(embeddings)

    noisy3 = _entropy_noisy_importance(logits, noise)           # (B, S, 1) f32

    # Per-batch k-th largest noisy score (the keep threshold).  Selection /
    # sorting has no clean Pallas TPU primitive and is O(B*S), so it stays as
    # JAX glue between the two kernels.
    thresholds = lax.top_k(noisy3[..., 0], num_to_keep)[0][:, -1]   # (B,)

    # Note: `>=` keeps every token tied exactly at the cutoff (could exceed k
    # on exact ties); the 1e-5 noise makes that vanishingly unlikely, matching
    # the PyTorch sort+scatter behaviour in practice.
    return _mask_multiply(embeddings, noisy3, thresholds)


if __name__ == "__main__":
    # Small, forward-implied shapes: batch=2, seq=8, hidden=32, vocab=16.
    B, S, D, V = 2, 8, 32, 16
    drop_prob = 0.5                       # -> num_to_keep = 4 tokens per sequence

    key = jax.random.PRNGKey(0)
    k_emb, k_log, k_noise = jax.random.split(key, 3)
    embeddings = jax.random.normal(k_emb, (B, S, D), dtype=jnp.float32)
    logits = jax.random.normal(k_log, (B, S, V), dtype=jnp.float32)
    noise = 1e-5 * jax.random.normal(k_noise, (B, S), dtype=jnp.float32)

    out = token_importance_dropout(
        embeddings, logits, noise, drop_prob=drop_prob, training=True
    )
    out = jax.block_until_ready(out)

    # Pure-JAX reference with identical semantics.
    ref_imp = jnp.sum(
        jax.nn.softmax(logits, axis=-1) * jax.nn.log_softmax(logits, axis=-1), axis=-1
    )                                                            # -entropy
    ref_noisy = ref_imp + noise
    k = int(S * (1 - drop_prob))
    ref_thr = lax.top_k(ref_noisy, k)[0][:, -1]
    ref_keep = ref_noisy >= ref_thr[:, None]
    ref_out = embeddings * ref_keep[..., None].astype(embeddings.dtype)

    kept = jnp.any(out != 0.0, axis=-1)                          # (B, S) bool
    assert out.shape == (B, S, D)
    assert int(kept.sum()) == B * k
    assert bool(jnp.allclose(out, ref_out, atol=1e-6))

    print("KERNEL_OK")
</pallas_src>

<mosaic_0001>
module attributes {stable_mosaic.version = 11 : i64} {
  func.func @kernel(%arg0: i32, %arg1: i32, %arg2: i32, %arg3: memref<1x8x16xf32, #tpu.memory_space<vmem>>, %arg4: memref<1x8x1xf32, #tpu.memory_space<vmem>>, %arg5: memref<1x8x1xf32, #tpu.memory_space<vmem>>, %arg6: memref<8x1xf32, #tpu.memory_space<vmem>>, %arg7: memref<8x1xf32, #tpu.memory_space<vmem>>, %arg8: memref<8x1xf32, #tpu.memory_space<vmem>>) attributes {dimension_semantics = [#tpu.dimension_semantics<parallel>, #tpu.dimension_semantics<parallel>, #tpu.dimension_semantics<arbitrary>], iteration_bounds = array<i64: 2, 1, 1>, scalar_prefetch = 0 : i64, scratch_operands = 3 : i64, tpu.core_type = #tpu.core_type<tc>, window_params = [{transform_indices = @transform_0, window_bounds = array<i64: 1, 8, 16>}, {transform_indices = @transform_1, window_bounds = array<i64: 1, 8, 1>}, {transform_indices = @transform_2, window_bounds = array<i64: 1, 8, 1>}]} {
    %c0_i32 = arith.constant 0 : i32
    %0 = arith.cmpi eq, %arg2, %c0_i32 : i32
    %1 = arith.extui %0 : i1 to i32
    %c0_i32_0 = arith.constant 0 : i32
    %2 = arith.cmpi ne, %1, %c0_i32_0 : i32
    scf.if %2 {
      %cst_21 = arith.constant -1.000000e+30 : f32
      %37 = vector.broadcast %cst_21 : f32 to vector<8x1xf32>
      %c0_22 = arith.constant 0 : index
      %c0_23 = arith.constant 0 : index
      %38 = vector.load %arg6[%c0_22, %c0_23] : memref<8x1xf32, #tpu.memory_space<vmem>>, vector<8x1xf32>
      tpu.vector_store %arg6[%c0_22, %c0_23], %37 {strides = array<i32>} : memref<8x1xf32, #tpu.memory_space<vmem>>, vector<8x1xf32>,
      %cst_24 = arith.constant 0.000000e+00 : f32
      %39 = vector.broadcast %cst_24 : f32 to vector<8x1xf32>
      %c0_25 = arith.constant 0 : index
      %c0_26 = arith.constant 0 : index
      %40 = vector.load %arg7[%c0_25, %c0_26] : memref<8x1xf32, #tpu.memory_space<vmem>>, vector<8x1xf32>
      tpu.vector_store %arg7[%c0_25, %c0_26], %39 {strides = array<i32>} : memref<8x1xf32, #tpu.memory_space<vmem>>, vector<8x1xf32>,
      %cst_27 = arith.constant 0.000000e+00 : f32
      %41 = vector.broadcast %cst_27 : f32 to vector<8x1xf32>
      %c0_28 = arith.constant 0 : index
      %c0_29 = arith.constant 0 : index
      %42 = vector.load %arg8[%c0_28, %c0_29] : memref<8x1xf32, #tpu.memory_space<vmem>>, vector<8x1xf32>
      tpu.vector_store %arg8[%c0_28, %c0_29], %41 {strides = array<i32>} : memref<8x1xf32, #tpu.memory_space<vmem>>, vector<8x1xf32>,
    } else {
    }
    %c0 = arith.constant 0 : index
    %c0_1 = arith.constant 0 : index
    %c0_2 = arith.constant 0 : index
    %3 = vector.load %arg3[%c0, %c0_1, %c0_2] : memref<1x8x16xf32, #tpu.memory_space<vmem>>, vector<1x8x16xf32>
    %4 = vector.shape_cast %3 : vector<1x8x16xf32> to vector<8x16xf32>
    %c0_3 = arith.constant 0 : index
    %c0_4 = arith.constant 0 : index
    %5 = vector.load %arg6[%c0_3, %c0_4] : memref<8x1xf32, #tpu.memory_space<vmem>>, vector<8x1xf32>
    %c0_5 = arith.constant 0 : index
    %c0_6 = arith.constant 0 : index
    %6 = vector.load %arg7[%c0_5, %c0_6] : memref<8x1xf32, #tpu.memory_space<vmem>>, vector<8x1xf32>
    %c0_7 = arith.constant 0 : index
    %c0_8 = arith.constant 0 : index
    %7 = vector.load %arg8[%c0_7, %c0_8] : memref<8x1xf32, #tpu.memory_space<vmem>>, vector<8x1xf32>
    %cst = arith.constant dense<0xFF800000> : vector<8xf32>
    %8 = vector.multi_reduction <maximumf>, %4, %cst [1] : vector<8x16xf32> to vector<8xf32>
    %9 = vector.shape_cast %8 : vector<8xf32> to vector<8x1xf32>
    %10 = arith.maximumf %5, %9 : vector<8x1xf32>
    %11 = arith.subf %5, %10 : vector<8x1xf32>
    %12 = math.exp %11 : vector<8x1xf32>
    %13 = vector.broadcast %10 : vector<8x1xf32> to vector<8x16xf32>
    %14 = arith.subf %4, %13 : vector<8x16xf32>
    %15 = math.exp %14 : vector<8x16xf32>
    %cst_9 = arith.constant -8.000000e+01 : f32
    %16 = vector.broadcast %cst_9 : f32 to vector<8x16xf32>
    %17 = arith.cmpf ogt, %14, %16 : vector<8x16xf32>
    %18 = arith.mulf %15, %14 : vector<8x16xf32>
    %cst_10 = arith.constant 0.000000e+00 : f32
    %19 = vector.broadcast %cst_10 : f32 to vector<8x16xf32>
    %20 = arith.select %17, %18, %19 : vector<8x16xi1>, vector<8x16xf32>
    %21 = arith.mulf %12, %6 : vector<8x1xf32>
    %cst_11 = arith.constant dense<0.000000e+00> : vector<8xf32>
    %22 = vector.multi_reduction <add>, %15, %cst_11 [1] : vector<8x16xf32> to vector<8xf32>
    %23 = vector.shape_cast %22 : vector<8xf32> to vector<8x1xf32>
    %24 = arith.addf %21, %23 : vector<8x1xf32>
    %25 = arith.mulf %11, %6 : vector<8x1xf32>
    %26 = arith.addf %7, %25 : vector<8x1xf32>
    %27 = arith.mulf %12, %26 : vector<8x1xf32>
    %cst_12 = arith.constant dense<0.000000e+00> : vector<8xf32>
    %28 = vector.multi_reduction <add>, %20, %cst_12 [1] : vector<8x16xf32> to vector<8xf32>
    %29 = vector.shape_cast %28 : vector<8xf32> to vector<8x1xf32>
    %30 = arith.addf %27, %29 : vector<8x1xf32>
    %c0_13 = arith.constant 0 : index
    %c0_14 = arith.constant 0 : index
    %31 = vector.load %arg6[%c0_13, %c0_14] : memref<8x1xf32, #tpu.memory_space<vmem>>, vector<8x1xf32>
    tpu.vector_store %arg6[%c0_13, %c0_14], %10 {strides = array<i32>} : memref<8x1xf32, #tpu.memory_space<vmem>>, vector<8x1xf32>,
    %c0_15 = arith.constant 0 : index
    %c0_16 = arith.constant 0 : index
    %32 = vector.load %arg7[%c0_15, %c0_16] : memref<8x1xf32, #tpu.memory_space<vmem>>, vector<8x1xf32>
    tpu.vector_store %arg7[%c0_15, %c0_16], %24 {strides = array<i32>} : memref<8x1xf32, #tpu.memory_space<vmem>>, vector<8x1xf32>,
    %c0_17 = arith.constant 0 : index
    %c0_18 = arith.constant 0 : index
    %33 = vector.load %arg8[%c0_17, %c0_18] : memref<8x1xf32, #tpu.memory_space<vmem>>, vector<8x1xf32>
    tpu.vector_store %arg8[%c0_17, %c0_18], %30 {strides = array<i32>} : memref<8x1xf32, #tpu.memory_space<vmem>>, vector<8x1xf32>,
    %c0_i32_19 = arith.constant 0 : i32
    %34 = arith.cmpi eq, %arg2, %c0_i32_19 : i32
    %35 = arith.extui %34 : i1 to i32
    %c0_i32_20 = arith.constant 0 : i32
    %36 = arith.cmpi ne, %35, %c0_i32_20 : i32
    scf.if %36 {
      %37 = tpu.reciprocal %24 : vector<8x1xf32> -> vector<8x1xf32>
      %38 = arith.mulf %30, %37 : vector<8x1xf32>
      %39 = math.log %24 : vector<8x1xf32>
      %40 = arith.subf %38, %39 : vector<8x1xf32>
      %c0_21 = arith.constant 0 : index
      %c0_22 = arith.constant 0 : index
      %c0_23 = arith.constant 0 : index
      %41 = vector.load %arg4[%c0_21, %c0_22, %c0_23] : memref<1x8x1xf32, #tpu.memory_space<vmem>>, vector<1x8x1xf32>
      %42 = vector.shape_cast %41 : vector<1x8x1xf32> to vector<8x1xf32>
      %43 = arith.addf %40, %42 : vector<8x1xf32>
      %c0_24 = arith.constant 0 : index
      %c0_25 = arith.constant 0 : index
      %c0_26 = arith.constant 0 : index
      %44 = vector.load %arg5[%c0_24, %c0_25, %c0_26] : memref<1x8x1xf32, #tpu.memory_space<vmem>>, vector<1x8x1xf32>
      %45 = vector.shape_cast %44 : vector<1x8x1xf32> to vector<8x1xf32>
      %46 = vector.shape_cast %43 : vector<8x1xf32> to vector<1x8x1xf32>
      tpu.vector_store %arg5[%c0_24, %c0_25, %c0_26], %46 {strides = array<i32>} : memref<1x8x1xf32, #tpu.memory_space<vmem>>, vector<1x8x1xf32>,
    } else {
    }
    return
  }
  func.func @transform_0(%arg0: i32, %arg1: i32, %arg2: i32) -> (i32, i32, i32) {
    %c0_i32 = arith.constant 0 : i32
    return %arg0, %arg1, %arg2 : i32, i32, i32
  }
  func.func @transform_1(%arg0: i32, %arg1: i32, %arg2: i32) -> (i32, i32, i32) {
    %c0_i32 = arith.constant 0 : i32
    %c0_i32_0 = arith.constant 0 : i32
    return %arg0, %arg1, %c0_i32 : i32, i32, i32
  }
  func.func @transform_2(%arg0: i32, %arg1: i32, %arg2: i32) -> (i32, i32, i32) {
    %c0_i32 = arith.constant 0 : i32
    %c0_i32_0 = arith.constant 0 : i32
    return %arg0, %arg1, %c0_i32 : i32, i32, i32
  }
}

</mosaic_0001>

<bundles_post_ra>
// kernel: tpu_custom_call.1
= control target key start
LH: loop header
LB: loop body
LE: loop exit
PB: predicated region body
PF: predicated region fallthrough
CT: control target
= control target key end

     0   :  { %s457_s9 = smov 0   ;;  %s459_s10 = smov 0   ;;  %s508_s0 = inlined_call_operand.vmem [shape: f32[2,8,16], index: 0, kind: input, shape index: {}]   ;;  %s509_s1 = inlined_call_operand.vmem [shape: f32[2,8,1], index: 1, kind: input, shape index: {}]   ;;  %s510_s2 = inlined_call_operand.vmem [shape: f32[2,8,1], index: 2, kind: output, shape index: {}]  }
   0x1   :  { %s461_s11 = smov 0  }
   0x2 LB: > { %s31_s12 = sadd.s32 1, %s433_s10  ;;  %p373_p0 = scmp.ge.s32.totalorder %s437_s11, 1  ;;  %s437_s11 = sphi %s461_s11, %s12_s11   ;;  %s433_s10 = sphi %s459_s10, %s512_s10   ;;  %s429_s9 = sphi %s457_s9, %s511_s9  }
   0x3   : > { %p33_p1 = scmp.ge.s32.totalorder %s31_s12, 2  ;;  %p156_p2 = scmp.lt.s32.totalorder %s437_s11, 3 }
   0x5   : > { %s514_s12 = smov (%p33_p1, %s31_s12), 0  ;;  %p157_p3 = pnand %p373_p0, %p156_p2 }
   0x6   : > { %p192_p4 = scmp.lt.s32.totalorder (!%p157_p3), %s429_s9, 1  ;;  %vm220_vm0 = vcmask (!%p157_p3), 7168   ;;  %v439_v0 = vmov (!%p157_p3), -1e+30   ;;  %vm228_vm1 = vcmask (!%p157_p3), 130048   ;;  %v440_v3 = vmov (!%p157_p3), 0.0  }
   0x7   : > { %160 = sbr.rel (%p157_p3) target bundleno = 470 (0x1d6), region = 28  ;;  %221 = vst.msk [vmem:[#allocation2] sm:$0xff] (!%p157_p3), %vm220_vm0, %v439_v0  ;;  %222 = vst.msk [vmem:[#allocation3] sm:$0xff] (!%p157_p3), %vm220_vm0, %v440_v3  ;;  %v441_v4 = vmov (!%p157_p3), 0  }
   0x8   : > { %223 = vst.msk [vmem:[#allocation4] sm:$0xff] (!%p157_p3), %vm220_vm0, %v440_v3  ;;  %406 = vset.pattern.permute.xlu0 (!%p157_p3), %v441_v4 }
   0xe   : > { %s516_s9 = smov (!%p192_p4, %s429_s9), 1  ;;  %v225_v5 = vld [vmem:[#allocation2] sm:$0xff]  ;;  %v226_v18 = vld [vmem:[#allocation3] sm:$0xff] }
   0xf   : > { %s476_s13 = sshll.u32 %s516_s9, 3  ;;  %v227_v21 = vld [vmem:[#allocation4] sm:$0xff] }
  0x10   : > { %s201_s16 = scalar_lea.vmem %s508_s0, %s476_s13  ;;  %s208_s19 = scalar_lea.vmem %s509_s1, %s476_s13 }
  0x11   : > { %v224_v1 = vld [vmem:[%s201_s16] sm:$0xff]  ;;  %s215_s22 = scalar_lea.vmem %s510_s2, %s476_s13 }
  0x12   : > { %v229_v2 = vsel %vm228_vm1, %v224_v1, -inf  ;;  %v271_v33 = vld [vmem:[%s208_s19] sm:$0xff] }
  0x13   : > { %230 = vmax.xlane.f32.xlu0 %v229_v2 }
  0xa0   : > { %v231_v6 = vpop.xlane.xlu0 %230 }
  0xa1   : > { %v232_v7 = vmax.f32 %v225_v5, %v231_v6 }
  0xa3   : > { %v233_v8 = vsub.f32 %v225_v5, %v232_v7  ;;  %260 = vst.msk [vmem:[#allocation2] sm:$0xff] %vm220_vm0, %v232_v7  ;;  %238 = vperm.xlu0 %406, %v232_v7  }
  0xa5   : > { %v234_v17 = vmul.f32 1.442695, %v233_v8  ;;  %v252_v20 = vmul.f32 %v233_v8, %v226_v18 }
  0xa7   : > { %v253_v25 = vadd.f32 %v252_v20, %v227_v21 }
 0x122   : > { %v239_v9 = vpop.permute.xlu0 %238 }
 0x123   : > { %v241_v10 = vsub.f32 %v224_v1, %v239_v9 }
 0x125   : > { %v242_v11 = vmul.f32 1.442695, %v241_v10  ;;  %vm244_vm2 = vcmp.gt.f32.partialorder %v241_v10, -80.0 }
 0x127   : > { %407 = vpow2.f32 %v242_v11 }
 0x128   : > { %409 = vpow2.f32 %v234_v17 }
 0x131   : > { %v408_v12 = vpop.eup %407 }
 0x132   : > { %v248_v13 = vsel %vm228_vm1, %v408_v12, 0.0  ;;  %v245_v14 = vmul.f32 %v408_v12, %v241_v10  ;;  %v410_v19 = vpop.eup %409 }
 0x133   : > { %249 = vadd.xlane.f32.xlu1 %v248_v13  ;;  %v247_v22 = vmul.f32 %v410_v19, %v226_v18  ;;  %v254_v26 = vmul.f32 %v410_v19, %v253_v25 }
 0x134   : > { %v246_v15 = vsel %vm244_vm2, %v245_v14, 0.0 }
 0x135   : > { %v255_v16 = vsel %vm228_vm1, %v246_v15, 0.0 }
 0x137   : > { %256 = vadd.xlane.f32.xlu1 %v255_v16 }
 0x1c0   : > { %v250_v23 = vpop.xlane.xlu1 %249 }
 0x1c1   : > { %v251_v24 = vadd.f32 %v250_v23, %v247_v22 }
 0x1c3   : > { %261 = vst.msk [vmem:[#allocation3] sm:$0xff] %vm220_vm0, %v251_v24  ;;  %411 = vrcp.f32 %v251_v24 }
 0x1c4   : > { %413 = vlog2.f32 %v251_v24  ;;  %v257_v27 = vpop.xlane.xlu1 %256 }
 0x1c5   : > { %v258_v28 = vadd.f32 %v257_v27, %v254_v26 }
 0x1c7   : > { %262 = vst.msk [vmem:[#allocation4] sm:$0xff] %vm220_vm0, %v258_v28 }
 0x1cd   : > { %v412_v29 = vpop.eup %411 }
 0x1ce   : > { %v414_v30 = vpop.eup %413  ;;  %v267_v31 = vmul.f32 %v412_v29, %v258_v28 }
 0x1cf   : > { %v269_v32 = vmul.f32 0.6931472, %v414_v30 }
 0x1d1   : > { %v270_v34 = vsub.f32 %v267_v31, %v269_v32 }
 0x1d3   : > { %v272_v35 = vadd.f32 %v271_v33, %v270_v34 }
 0x1d5   : > { %273 = vst.msk [vmem:[%s215_s22] sm:$0xff] %vm220_vm0, %v272_v35 }
 0x1d6 PF: > { %s12_s11 = sadd.s32 1, %s437_s11   ;;  %s511_s9 = smov %s433_s10 }
 0x1d7   : > { %p9_p5 = scmp.ge.s32.totalorder %s12_s11, 4   ;;  %s512_s10 = smov %s514_s12 }
 0x1d9   :  { %11 = sbr.rel (!%p9_p5) target bundleno = 2 (0x2), region = 69 }

</bundles_post_ra>
